<compile_context>
chip_gen: v7x
topology: tpu7x:2x2x1
jax: 0.10.0
libtpu: 0.0.40
codegen_flags: <defaults>
</compile_context>

<pallas_src>
import functools

import jax
import jax.numpy as jnp
from jax.experimental import pallas as pl
from jax.experimental.pallas import tpu as pltpu

_LANES = 128
_SUBLANES = 8


def _dice_batch_kernel(pred_ref, true_ref, out_ref, *, smooth):
    """Small-input path: bN whole samples per grid step, no reduction axis."""
    p = pred_ref[...].astype(jnp.float32)        # (bN, rows, 128)
    t = true_ref[...].astype(jnp.float32)
    # Sublane reduce then lane reduce, per sample.
    inter = jnp.sum(jnp.sum(p * t, axis=1, keepdims=True), axis=2, keepdims=True)
    union = jnp.sum(jnp.sum(p + t, axis=1, keepdims=True), axis=2, keepdims=True)
    dice = (2.0 * inter + smooth) / (union + smooth)          # (bN, 1, 1)
    out_ref[...] = jnp.broadcast_to(dice, out_ref.shape)


def _dice_stream_kernel(pred_ref, true_ref, out_ref, inter_ref, union_ref, *,
                        smooth, rt, tail_rows, needs_mask):
    """Streaming path: one sample per batch step, reduce over row blocks."""
    k = pl.program_id(1)
    last = pl.num_programs(1) - 1

    # Zero accumulators on the first reduction step of each batch element
    # (grid order: batch outer / reduction inner).
    @pl.when(k == 0)
    def _():
        inter_ref[...] = jnp.zeros_like(inter_ref)
        union_ref[...] = jnp.zeros_like(union_ref)

    p = pred_ref[0].astype(jnp.float32)          # (rt, 128)
    t = true_ref[0].astype(jnp.float32)

    def _accumulate(pv, tv):
        # Per-sublane partials: vreg-aligned (free) reshape + VPU adds only.
        # The single cross-sublane/lane XLU reduce happens in the epilogue.
        inter_ref[...] += jnp.sum(
            (pv * tv).reshape(rt // _SUBLANES, _SUBLANES, _LANES), axis=0)
        union_ref[...] += jnp.sum(
            (pv + tv).reshape(rt // _SUBLANES, _SUBLANES, _LANES), axis=0)

    if needs_mask:
        # Only the final block overhangs the array (grid uses cdiv); mask just
        # that step so every other step takes the unmasked accumulate path.
        @pl.when(k != last)
        def _():
            _accumulate(p, t)

        @pl.when(k == last)
        def _():
            valid = jax.lax.broadcasted_iota(
                jnp.int32, (rt, _LANES), 0) < tail_rows
            _accumulate(jnp.where(valid, p, 0.0), jnp.where(valid, t, 0.0))
    else:
        _accumulate(p, t)

    # Finalize: single sublane + lane reduce, per-sample dice broadcast into a
    # lane-dense output block.
    @pl.when(k == last)
    def _():
        inter = jnp.sum(jnp.sum(inter_ref[...], axis=0, keepdims=True),
                        axis=1, keepdims=True)                    # (1, 1)
        union = jnp.sum(jnp.sum(union_ref[...], axis=0, keepdims=True),
                        axis=1, keepdims=True)                    # (1, 1)
        dice = (2.0 * inter + smooth) / (union + smooth)          # (1, 1)
        out_ref[...] = jnp.broadcast_to(dice.reshape(1, 1, 1), out_ref.shape)


def dice_loss_pallas(y_pred: jax.Array, y_true: jax.Array,
                     smooth: float = 1e-07, row_tile: int = 8192) -> jax.Array:
    """Dice loss. Accepts f32/bf16/fp16 inputs; accumulation is always f32."""
    if y_pred.shape != y_true.shape:
        raise ValueError(
            f"Shape mismatch: y_pred shape {y_pred.shape} vs y_true shape {y_true.shape}")

    n = y_pred.shape[0]
    # flatten(1): (N, C, H, W) -> (N, L)
    pred2d = y_pred.reshape(n, -1)
    true2d = y_true.reshape(n, -1)
    l = pred2d.shape[1]

    # Lane pad only when L is not a multiple of 128 (zero pad is sum-preserving).
    l128 = pl.cdiv(l, _LANES) * _LANES
    if l128 != l:
        pad = [(0, 0), (0, l128 - l)]
        pred2d = jnp.pad(pred2d, pad)
        true2d = jnp.pad(true2d, pad)

    rows = l128 // _LANES
    pred3d = pred2d.reshape(n, rows, _LANES)   # contiguous no-op reshapes
    true3d = true2d.reshape(n, rows, _LANES)

    itemsize = jnp.dtype(y_pred.dtype).itemsize
    out_shape = jax.ShapeDtypeStruct((n, _SUBLANES, _LANES), jnp.float32)

    if rows <= row_tile:
        # ---- Small-sample path: several samples per grid step. ----
        bn = min(n, max(1, row_tile // rows))
        grid_n = pl.cdiv(n, bn)
        in_block_bytes = bn * rows * _LANES * itemsize
        vmem_limit = int(min(64 * 2**20,
                             max(32 * 2**20, 6 * in_block_bytes + 16 * 2**20)))
        kernel = functools.partial(_dice_batch_kernel, smooth=float(smooth))
        out = pl.pallas_call(
            kernel,
            out_shape=out_shape,
            grid_spec=pltpu.PrefetchScalarGridSpec(
                num_scalar_prefetch=0,
                grid=(grid_n,),
                in_specs=[
                    pl.BlockSpec((bn, rows, _LANES), lambda i: (i, 0, 0)),
                    pl.BlockSpec((bn, rows, _LANES), lambda i: (i, 0, 0)),
                ],
                out_specs=pl.BlockSpec((bn, _SUBLANES, _LANES), lambda i: (i, 0, 0)),
            ),
            compiler_params=pltpu.CompilerParams(
                dimension_semantics=("parallel",),
                vmem_limit_bytes=vmem_limit,
            ),
        )(pred3d, true3d)
    else:
        # ---- Streaming path: batch outer, row-block reduction inner. ----
        rt = max((row_tile // _SUBLANES) * _SUBLANES, _SUBLANES)
        grid_k = pl.cdiv(rows, rt)
        needs_mask = (rows % rt) != 0
        tail_rows = rows - (grid_k - 1) * rt     # compile-time constant
        in_block_bytes = rt * _LANES * itemsize
        # 2 inputs x 2 buffers + f32 elementwise temps + headroom.
        vmem_limit = int(min(64 * 2**20,
                             max(32 * 2**20,
                                 4 * in_block_bytes + 2 * rt * _LANES * 4 + 16 * 2**20)))
        kernel = functools.partial(
            _dice_stream_kernel, smooth=float(smooth), rt=rt,
            tail_rows=tail_rows, needs_mask=needs_mask)
        out = pl.pallas_call(
            kernel,
            out_shape=out_shape,
            grid_spec=pltpu.PrefetchScalarGridSpec(
                num_scalar_prefetch=0,
                grid=(n, grid_k),
                in_specs=[
                    pl.BlockSpec((1, rt, _LANES), lambda i, k: (i, k, 0)),
                    pl.BlockSpec((1, rt, _LANES), lambda i, k: (i, k, 0)),
                ],
                out_specs=pl.BlockSpec((1, _SUBLANES, _LANES), lambda i, k: (i, 0, 0)),
                scratch_shapes=[
                    pltpu.VMEM((_SUBLANES, _LANES), jnp.float32),  # intersection
                    pltpu.VMEM((_SUBLANES, _LANES), jnp.float32),  # union
                ],
            ),
            compiler_params=pltpu.CompilerParams(
                dimension_semantics=("parallel", "arbitrary"),
                vmem_limit_bytes=vmem_limit,
            ),
        )(pred3d, true3d)

    dice = out[:, 0, 0]                 # (N,)
    return 1.0 - jnp.mean(dice)


def dice_loss_ref(y_pred, y_true, smooth=1e-07):
    p = y_pred.reshape(y_pred.shape[0], -1).astype(jnp.float32)
    t = y_true.reshape(y_true.shape[0], -1).astype(jnp.float32)
    inter = jnp.sum(p * t, axis=1)
    union = jnp.sum(p, axis=1) + jnp.sum(t, axis=1)
    dice = (2.0 * inter + smooth) / (union + smooth)
    return 1.0 - jnp.mean(dice)


if __name__ == "__main__":
    key = jax.random.PRNGKey(0)
    k1, k2, k3, k4 = jax.random.split(key, 4)

    # Primary shape implied by the module: NCHW segmentation masks (small path,
    # both samples packed into a single grid step).
    N, C, H, W = 2, 4, 16, 16
    y_pred = jax.nn.sigmoid(jax.random.normal(k1, (N, C, H, W), dtype=jnp.float32))
    y_true = (jax.random.uniform(k2, (N, C, H, W)) > 0.5).astype(jnp.float32)
    loss = jax.block_until_ready(dice_loss_pallas(y_pred, y_true))
    ref = jax.block_until_ready(dice_loss_ref(y_pred, y_true))
    assert jnp.allclose(loss, ref, atol=1e-5, rtol=1e-5), (loss, ref)

    # Ragged shape with a tiny row tile: exercises the lane pad (1900 % 128 != 0),
    # the streaming path (15 rows / 8-row tile -> 2 steps) and the last-step-only
    # tail mask (tail = 7 rows).
    y_pred2 = jax.nn.sigmoid(jax.random.normal(k3, (2, 1, 19, 100), dtype=jnp.float32))
    y_true2 = (jax.random.uniform(k4, (2, 1, 19, 100)) > 0.5).astype(jnp.float32)
    loss2 = jax.block_until_ready(dice_loss_pallas(y_pred2, y_true2, row_tile=8))
    ref2 = jax.block_until_ready(dice_loss_ref(y_pred2, y_true2))
    assert jnp.allclose(loss2, ref2, atol=1e-5, rtol=1e-5), (loss2, ref2)

    # bf16 inputs (halved HBM traffic), streaming path without tail mask:
    # L = 4*32*32 = 4096 -> rows = 32, row_tile=16 -> 2 full steps per sample.
    k5, k6 = jax.random.split(k4)
    y_pred3 = jax.nn.sigmoid(
        jax.random.normal(k5, (2, 4, 32, 32), dtype=jnp.float32)).astype(jnp.bfloat16)
    y_true3 = (jax.random.uniform(k6, (2, 4, 32, 32)) > 0.5).astype(jnp.bfloat16)
    loss3 = jax.block_until_ready(dice_loss_pallas(y_pred3, y_true3, row_tile=16))
    ref3 = jax.block_until_ready(dice_loss_ref(y_pred3, y_true3))
    assert jnp.allclose(loss3, ref3, atol=1e-5, rtol=1e-5), (loss3, ref3)

    print("KERNEL_OK")
</pallas_src>

<mosaic_0001>
module attributes {stable_mosaic.version = 11 : i64} {
  func.func @_dice_batch_kernel(%arg0: i32, %arg1: memref<2x8x128xf32, #tpu.memory_space<vmem>>, %arg2: memref<2x8x128xf32, #tpu.memory_space<vmem>>, %arg3: memref<2x8x128xf32, #tpu.memory_space<vmem>>) attributes {dimension_semantics = [#tpu.dimension_semantics<parallel>], iteration_bounds = array<i64: 1>, scalar_prefetch = 0 : i64, scratch_operands = 0 : i64, tpu.core_type = #tpu.core_type<tc>, window_params = [{transform_indices = @transform_0, window_bounds = array<i64: 2, 8, 128>}, {transform_indices = @transform_1, window_bounds = array<i64: 2, 8, 128>}, {transform_indices = @transform_2, window_bounds = array<i64: 2, 8, 128>}]} {
    %c0 = arith.constant 0 : index
    %c0_0 = arith.constant 0 : index
    %c0_1 = arith.constant 0 : index
    %0 = vector.load %arg1[%c0, %c0_0, %c0_1] : memref<2x8x128xf32, #tpu.memory_space<vmem>>, vector<2x8x128xf32>
    %c0_2 = arith.constant 0 : index
    %c0_3 = arith.constant 0 : index
    %c0_4 = arith.constant 0 : index
    %1 = vector.load %arg2[%c0_2, %c0_3, %c0_4] : memref<2x8x128xf32, #tpu.memory_space<vmem>>, vector<2x8x128xf32>
    %2 = arith.mulf %0, %1 : vector<2x8x128xf32>
    %cst = arith.constant dense<0.000000e+00> : vector<2x128xf32>
    %3 = vector.multi_reduction <add>, %2, %cst [1] : vector<2x8x128xf32> to vector<2x128xf32>
    %4 = vector.shape_cast %3 : vector<2x128xf32> to vector<2x1x128xf32>
    %cst_5 = arith.constant dense<0.000000e+00> : vector<2x1xf32>
    %5 = vector.multi_reduction <add>, %4, %cst_5 [2] : vector<2x1x128xf32> to vector<2x1xf32>
    %6 = vector.shape_cast %5 : vector<2x1xf32> to vector<2x1x1xf32>
    %7 = arith.addf %0, %1 : vector<2x8x128xf32>
    %cst_6 = arith.constant dense<0.000000e+00> : vector<2x128xf32>
    %8 = vector.multi_reduction <add>, %7, %cst_6 [1] : vector<2x8x128xf32> to vector<2x128xf32>
    %9 = vector.shape_cast %8 : vector<2x128xf32> to vector<2x1x128xf32>
    %cst_7 = arith.constant dense<0.000000e+00> : vector<2x1xf32>
    %10 = vector.multi_reduction <add>, %9, %cst_7 [2] : vector<2x1x128xf32> to vector<2x1xf32>
    %11 = vector.shape_cast %10 : vector<2x1xf32> to vector<2x1x1xf32>
    %cst_8 = arith.constant 2.000000e+00 : f32
    %12 = vector.broadcast %cst_8 : f32 to vector<2x1x1xf32>
    %13 = arith.mulf %12, %6 : vector<2x1x1xf32>
    %cst_9 = arith.constant 1.000000e-07 : f32
    %14 = vector.broadcast %cst_9 : f32 to vector<2x1x1xf32>
    %15 = arith.addf %13, %14 : vector<2x1x1xf32>
    %cst_10 = arith.constant 1.000000e-07 : f32
    %16 = vector.broadcast %cst_10 : f32 to vector<2x1x1xf32>
    %17 = arith.addf %11, %16 : vector<2x1x1xf32>
    %18 = arith.divf %15, %17 : vector<2x1x1xf32>
    %19 = vector.shape_cast %18 : vector<2x1x1xf32> to vector<2x1x1xf32>
    %20 = vector.broadcast %19 : vector<2x1x1xf32> to vector<2x8x128xf32>
    %c0_11 = arith.constant 0 : index
    %c0_12 = arith.constant 0 : index
    %c0_13 = arith.constant 0 : index
    %21 = vector.load %arg3[%c0_11, %c0_12, %c0_13] : memref<2x8x128xf32, #tpu.memory_space<vmem>>, vector<2x8x128xf32>
    tpu.vector_store %arg3[%c0_11, %c0_12, %c0_13], %20 {strides = array<i32>} : memref<2x8x128xf32, #tpu.memory_space<vmem>>, vector<2x8x128xf32>,
    return
  }
  func.func @transform_0(%arg0: i32) -> (i32, i32, i32) {
    %c0_i32 = arith.constant 0 : i32
    %c0_i32_0 = arith.constant 0 : i32
    %c0_i32_1 = arith.constant 0 : i32
    return %arg0, %c0_i32, %c0_i32_0 : i32, i32, i32
  }
  func.func @transform_1(%arg0: i32) -> (i32, i32, i32) {
    %c0_i32 = arith.constant 0 : i32
    %c0_i32_0 = arith.constant 0 : i32
    %c0_i32_1 = arith.constant 0 : i32
    return %arg0, %c0_i32, %c0_i32_0 : i32, i32, i32
  }
  func.func @transform_2(%arg0: i32) -> (i32, i32, i32) {
    %c0_i32 = arith.constant 0 : i32
    %c0_i32_0 = arith.constant 0 : i32
    %c0_i32_1 = arith.constant 0 : i32
    return %arg0, %c0_i32, %c0_i32_0 : i32, i32, i32
  }
}

</mosaic_0001>

<bundles_post_ra>
// kernel: tpu_custom_call.1
= control target key start
LH: loop header
LB: loop body
LE: loop exit
PB: predicated region body
PF: predicated region fallthrough
CT: control target
= control target key end

     0   :  { %7 = vsyncpa [#allocation3], 0  ;;  %s256_s0 = inlined_call_operand.hbm [shape: f32[2,8,128], index: 0, kind: input, shape index: {}]   ;;  %s257_s1 = inlined_call_operand.hbm [shape: f32[2,8,128], index: 1, kind: input, shape index: {}]   ;;  %s258_s2 = inlined_call_operand.hbm [shape: f32[2,8,128], index: 2, kind: output, shape index: {}]  }
   0x1   :  { %8 = vsyncpa [#allocation6], 0 }
   0x2   :  { %9 = vsyncpa [#allocation4], 0  ;;  %s191_s9 = smov [#allocation2]   ;;  %s119_s13 = scalar_lea.hbm %s256_s0, 256 }
   0x3   :  { %s15_s10 = sshll.u32 %s191_s9, 4  ;;  %p120_p0 = scmp.ne.s32.totalorder %s256_s0, %s119_s13  ;;  %s16_s10 = int_to_ptr.vmem [resolvable:$true] %s15_s10 }
   0x4   :  { %p123_p1 = scmp.lt.u32.totalorder %s119_s13, %s256_s0 }
   0x6   :  { %p125_p2 = pnand %p123_p1, %p120_p0 }
   0x8   :  { %128 = shalt.err (!%p125_p2)
}
   0x9   :  { %s129_s18 = scalar_lea.vmem %s16_s10, 256  ;;  %p134_p4 = scmp.lt.s32.totalorder %s16_s10, %s16_s10 }
   0xa   :  { %p130_p3 = scmp.ne.s32.totalorder %s16_s10, %s129_s18  ;;  %p135_p5 = scmp.lt.s32.totalorder %s129_s18, %s129_s18 }
   0xc   :  { %p136_p6 = por %p135_p5, %p134_p4 }
   0xe   :  { %p137_p7 = pnand %p136_p6, %p130_p3 }
  0x10   :  { %140 = shalt.err (!%p137_p7)
}
  0x11   :  { %s192_s19 = smov 128   ;;  %s193_s20 = smov 8  }
  0x12   :  { %21 = dma.hbm_to_vmem [thread:$0]  %s256_s0, 256, %s16_s10, [#allocation3], %s192_s19, %s192_s19, %s193_s20  }
  0x13   :  { %s194_s23 = smov [#allocation5]   ;;  %s141_s27 = scalar_lea.hbm %s257_s1, 256 }
  0x14   :  { %s27_s24 = sshll.u32 %s194_s23, 4  ;;  %p142_p8 = scmp.ne.s32.totalorder %s257_s1, %s141_s27  ;;  %s28_s24 = int_to_ptr.vmem [resolvable:$true] %s27_s24 }
  0x15   :  { %p145_p9 = scmp.lt.u32.totalorder %s141_s27, %s257_s1 }
  0x17   :  { %p147_p10 = pnand %p145_p9, %p142_p8 }
  0x19   :  { %150 = shalt.err (!%p147_p10)
}
  0x1a   :  { %s151_s4 = scalar_lea.vmem %s28_s24, 256  ;;  %p156_p12 = scmp.lt.s32.totalorder %s28_s24, %s28_s24 }
  0x1b   :  { %p152_p11 = scmp.ne.s32.totalorder %s28_s24, %s151_s4  ;;  %p157_p13 = scmp.lt.s32.totalorder %s151_s4, %s151_s4 }
  0x1d   :  { %p158_p0 = por %p157_p13, %p156_p12 }
  0x1f   :  { %p159_p1 = pnand %p158_p0, %p152_p11 }
  0x21   :  { %162 = shalt.err (!%p159_p1)
}
  0x22   :  { %33 = dma.hbm_to_vmem [thread:$0]  %s257_s1, 256, %s28_s24, [#allocation6], %s192_s19, %s192_s19, %s193_s20  }
  0x23   :  { %185 = dma.done.wait [#allocation3], 256  }
  0x24   :  { %186 = vsyncadd [#allocation3], 4294967040 }
  0x25   :  { %187 = dma.done.wait [#allocation6], 256  }
  0x26   :  { %188 = vsyncadd [#allocation6], 4294967040  ;;  %v40_v0 = vld [vmem:[#allocation2] sm:$0xff]  ;;  %v42_v1 = vld [vmem:[#allocation5] sm:$0xff]  ;;  %s195_s1 = smov [#allocation7]  }
  0x27   :  { %v41_v2 = vld [vmem:[#allocation2 + $0x8] sm:$0xff]  ;;  %v62_v3 = vadd.f32 %v42_v1, %v40_v0  ;;  %v43_v4 = vld [vmem:[#allocation5 + $0x8] sm:$0xff]  ;;  %v44_v5 = vmul.f32 %v42_v1, %v40_v0  ;;  %s97_s6 = sshll.u32 %s195_s1, 4  ;;  %s98_s6 = int_to_ptr.vmem [resolvable:$true] %s97_s6 }
  0x28   :  { %v63_v6 = vadd.f32 %v43_v4, %v41_v2  ;;  %v45_v7 = vmul.f32 %v43_v4, %v41_v2  ;;  %s163_s7 = scalar_lea.vmem %s98_s6, 256  ;;  %p168_p3 = scmp.lt.s32.totalorder %s98_s6, %s98_s6 }
  0x29   :  { %v64_v8 = vrot.slane %v62_v3, 4  ;;  %v46_v9 = vrot.slane %v44_v5, 4  ;;  %p164_p2 = scmp.ne.s32.totalorder %s98_s6, %s163_s7  ;;  %p169_p4 = scmp.lt.s32.totalorder %s163_s7, %s163_s7 }
  0x2a   :  { %v70_v10 = vrot.slane %v63_v6, 4  ;;  %v52_v11 = vrot.slane %v45_v7, 4 }
  0x2b   :  { %v65_v12 = vadd.f32 %v64_v8, %v62_v3  ;;  %v47_v13 = vadd.f32 %v46_v9, %v44_v5  ;;  %p170_p5 = por %p169_p4, %p168_p3 }
  0x2c   :  { %v71_v14 = vadd.f32 %v70_v10, %v63_v6  ;;  %v53_v15 = vadd.f32 %v52_v11, %v45_v7 }
  0x2d   :  { %v66_v16 = vrot.slane %v65_v12, 2  ;;  %v48_v17 = vrot.slane %v47_v13, 2  ;;  %p171_p6 = pnand %p170_p5, %p164_p2 }
  0x2e   :  { %v72_v18 = vrot.slane %v71_v14, 2  ;;  %v54_v19 = vrot.slane %v53_v15, 2 }
  0x2f   :  { %v67_v20 = vadd.f32 %v66_v16, %v65_v12  ;;  %v49_v21 = vadd.f32 %v48_v17, %v47_v13 }
  0x30   :  { %v73_v22 = vadd.f32 %v72_v18, %v71_v14  ;;  %v55_v23 = vadd.f32 %v54_v19, %v53_v15 }
  0x31   :  { %v68_v24 = vrot.slane %v67_v20, 1  ;;  %v50_v25 = vrot.slane %v49_v21, 1 }
  0x32   :  { %v74_v26 = vrot.slane %v73_v22, 1  ;;  %v56_v27 = vrot.slane %v55_v23, 1 }
  0x33   :  { %v69_v28 = vadd.f32 %v68_v24, %v67_v20  ;;  %v51_v29 = vadd.f32 %v50_v25, %v49_v21 }
  0x34   :  { %v75_v30 = vadd.f32 %v74_v26, %v73_v22  ;;  %v57_v31 = vadd.f32 %v56_v27, %v55_v23 }
  0x35   :  { %76 = vadd.xlane.f32.xlu0 %v69_v28  ;;  %58 = vadd.xlane.f32.xlu1 %v51_v29 }
  0x39   :  { %78 = vadd.xlane.f32.xlu0 %v75_v30  ;;  %60 = vadd.xlane.f32.xlu1 %v57_v31 }
  0xc2   :  { %v77_v32 = vpop.xlane.xlu0 %76  ;;  %v59_v34 = vpop.xlane.xlu1 %58 }
  0xc3   :  { %v84_v33 = vadd.f32 1e-07, %v77_v32  ;;  %v80_v37 = vmul.f32 2.0, %v59_v34 }
  0xc5   :  { %115 = vrcp.f32 %v84_v33  ;;  %v82_v39 = vadd.f32 1e-07, %v80_v37 }
  0xc6   :  { %v79_v35 = vpop.xlane.xlu0 %78  ;;  %v61_v38 = vpop.xlane.xlu1 %60 }
  0xc7   :  { %v85_v36 = vadd.f32 1e-07, %v79_v35  ;;  %v81_v40 = vmul.f32 2.0, %v61_v38 }
  0xc9   :  { %117 = vrcp.f32 %v85_v36  ;;  %v83_v43 = vadd.f32 1e-07, %v81_v40 }
  0xcf   :  { %v116_v41 = vpop.eup %115 }
  0xd0   :  { %v87_v42 = vmul.f32 %v116_v41, %v82_v39 }
  0xd2   :  { %90 = vst [vmem:[#allocation7] sm:$0xff] %v87_v42 }
  0xd3   :  { %v118_v44 = vpop.eup %117 }
  0xd4   :  { %v89_v45 = vmul.f32 %v118_v44, %v83_v43 }
  0xd6   :  { %91 = vst [vmem:[#allocation7 + $0x8] sm:$0xff] %v89_v45 }
  0xd7   :  { %174 = shalt.err (!%p171_p6)
}
  0xd8   :  { %s175_s10 = scalar_lea.hbm %s258_s2, 256 }
  0xd9   :  { %p176_p7 = scmp.ne.s32.totalorder %s258_s2, %s175_s10  ;;  %p179_p8 = scmp.lt.u32.totalorder %s175_s10, %s258_s2 }
  0xdb   :  { %p181_p9 = pnand %p179_p8, %p176_p7 }
  0xdd   :  { %184 = shalt.err (!%p181_p9)
}
  0xde   :  { %103 = dma.vmem_to_hbm [thread:$0]  %s98_s6, 256, %s258_s2, [#allocation4], %s192_s19, %s192_s19, %s193_s20  }
  0xdf   :  { %189 = dma.done.wait [#allocation4], 256  }
  0xe0   :  { %190 = vsyncadd [#allocation4], 4294967040 }
  0xe1   :  { %107 = vsyncpa [#allocation3], 1 }
  0xe2   :  { %108 = vsyncpa [#allocation6], 1 }
  0xe3   :  { %109 = vsyncpa [#allocation4], 1 }

</bundles_post_ra>
